<compile_context>
chip_gen: v7x
topology: tpu7x:2x2x1
jax: 0.10.0
libtpu: 0.0.40
codegen_flags: <defaults>
</compile_context>

<pallas_src>
import math
import jax
import jax.numpy as jnp
from jax.experimental import pallas as pl
from jax.experimental.pallas import tpu as pltpu

NUM_GROUPS = 32
EPS = 1e-5


# --------------------------------------------------------------------------------------------
# helpers
# --------------------------------------------------------------------------------------------
def _round_down_multiple(x, m):
    return (x // m) * m


def _choose_l_tile(L, C, itemsize):
    """Largest L tile (multiple of 128 that divides L) targeting ~4 MiB per x block."""
    target = (4 * 1024 * 1024) // max(1, C * itemsize)
    target = max(128, min(4096, _round_down_multiple(target, 128)))
    # TODO(synk): on v5e (128 MiB VMEM, slow HBM) a larger target (~4096) plus
    # pipeline_mode=pl.Buffered(3) on the x spec hides DMA better; keep one tuning here for now.
    if L <= target or L < 128:
        return L
    t = min(target, _round_down_multiple(L, 128))
    while t >= 128:
        if L % t == 0:
            return t
        t -= 128
    return L  # no friendly divisor -> full slab fallback


def _vmem_limit(bytes_needed):
    """Scoped-VMEM limit: enough for the tiles, capped at 75% of this chip's physical VMEM."""
    try:
        cap = pltpu.get_tpu_info().vmem_capacity_bytes
    except Exception:  # info query unavailable -> conservative (v7x-sized) assumption
        cap = 64 * 1024 * 1024
    return int(min(int(0.75 * cap), max(32 * 1024 * 1024, bytes_needed)))


# --------------------------------------------------------------------------------------------
# pass 1: per-channel sum / sum-of-squares, accumulated over L tiles
# --------------------------------------------------------------------------------------------
def _group_stats_kernel(x_ref, s_ref):
    """Grid (N, L//TL).  x block (1, C, TL); output block (1, C, 2) resident across L tiles."""
    @pl.when(pl.program_id(1) == 0)
    def _():
        s_ref[...] = jnp.zeros_like(s_ref)

    x = x_ref[0].astype(jnp.float32)                                 # (C, TL)
    s_ref[0, :, 0:1] += jnp.sum(x, axis=1, keepdims=True)            # per-channel sum
    s_ref[0, :, 1:2] += jnp.sum(x * x, axis=1, keepdims=True)        # per-channel sum of squares


# --------------------------------------------------------------------------------------------
# pass 2: normalize + folded projection (bf16 MXU, f32 accumulate) + bias + residual
# --------------------------------------------------------------------------------------------
def _norm_proj_residual_kernel(x_ref, aux_ref, w_ref, o_ref):
    """Grid (N, L//TL), both axes parallel.  aux = [mean, rstd, bias] per channel (f32)."""
    x = x_ref[0].astype(jnp.float32)                                 # (C, TL)
    mean = aux_ref[0, :, 0:1]                                        # (C, 1)
    rstd = aux_ref[0, :, 1:2]                                        # (C, 1)
    bias = aux_ref[0, :, 2:3]                                        # (C, 1)

    xhat = (x - mean) * rstd                                         # f32 GroupNorm (affine folded into w)
    y = jnp.dot(w_ref[...], xhat.astype(w_ref.dtype),
                preferred_element_type=jnp.float32)                  # (C, TL) f32 accumulate on MXU
    o_ref[0] = (y + bias + x).astype(o_ref.dtype)                    # bias + residual


# --------------------------------------------------------------------------------------------
# wrapper
# --------------------------------------------------------------------------------------------
def vae_attention_block(x_nchw, params, matmul_dtype=jnp.bfloat16):
    N, C, H, W = x_nchw.shape
    assert C % NUM_GROUPS == 0, "GroupNorm(32, C) requires C % 32 == 0"
    G = NUM_GROUPS
    gs = C // G
    L = H * W
    x_cl = x_nchw.reshape(N, C, L)                  # NCHW-native: free contiguous reshape
    act_dtype = x_cl.dtype
    itemsize = jnp.dtype(act_dtype).itemsize

    # ---- fold the entire linear path into one (C, C) matrix + one (C,) bias (f32, in XLA) ----
    # TODO(synk): in a real model precompute w_g / b_all once at weight-load time, not per call.
    f32 = jnp.float32
    w_v = params["w_in"][2 * C:3 * C, :].astype(f32)
    b_v = params["b_in"][2 * C:3 * C].astype(f32)
    w_out = params["w_out"].astype(f32)
    b_out = params["b_out"].astype(f32)
    gamma = params["gamma"].astype(f32)
    beta = params["beta"].astype(f32)

    w_fold = w_out @ w_v                                             # (C, C) = W_out @ W_v
    w_g = (w_fold * gamma[None, :]).astype(matmul_dtype)             # fold diag(gamma) into columns
    b_all = w_fold @ beta + w_out @ b_v + b_out                      # (C,)

    TL = _choose_l_tile(L, C, max(itemsize, 4))
    n_lt = L // TL
    x_block = C * TL * itemsize

    # -------------------- pass 1: per-channel sum / sum-of-squares --------------------
    stats = pl.pallas_call(
        _group_stats_kernel,
        out_shape=jax.ShapeDtypeStruct((N, C, 2), jnp.float32),
        grid_spec=pltpu.PrefetchScalarGridSpec(
            num_scalar_prefetch=0,
            grid=(N, n_lt),
            in_specs=[pl.BlockSpec((1, C, TL), lambda n, l: (n, 0, l))],
            out_specs=pl.BlockSpec((1, C, 2), lambda n, l: (n, 0, 0)),
        ),
        compiler_params=pltpu.CompilerParams(
            dimension_semantics=("parallel", "arbitrary"),
            vmem_limit_bytes=_vmem_limit(4 * x_block + 2 * C * TL * 4 + 4 * C * 128 * 4),
        ),
        cost_estimate=pl.CostEstimate(
            flops=int(3 * N * C * L),
            transcendentals=0,
            bytes_accessed=int(N * C * L * itemsize + N * C * 2 * 4),
        ),
    )(x_cl)

    # -------------- tiny group combine in XLA (N*C*2 floats; negligible) --------------
    cnt = float(gs * L)
    g_stats = stats.reshape(N, G, gs, 2).sum(axis=2)                 # (N, G, 2)
    mean_g = g_stats[..., 0] / cnt
    # single-pass variance; fine in f32 for activation-scale data (|mean| ~ O(1)).
    var_g = jnp.maximum(g_stats[..., 1] / cnt - mean_g * mean_g, 0.0)
    rstd_g = jax.lax.rsqrt(var_g + EPS)
    mean_c = jnp.repeat(mean_g, gs, axis=1)                          # (N, C)
    rstd_c = jnp.repeat(rstd_g, gs, axis=1)                          # (N, C)
    bias_c = jnp.broadcast_to(b_all[None, :], (N, C))
    aux = jnp.stack([mean_c, rstd_c, bias_c], axis=-1).astype(jnp.float32)   # (N, C, 3)

    # -------------------- pass 2: normalize + folded projection + residual --------------------
    w_bytes = C * C * jnp.dtype(matmul_dtype).itemsize
    vmem_need = (2 * x_block                       # x double-buffer
                 + 2 * C * TL * itemsize           # out double-buffer
                 + 2 * w_bytes                     # weight buffers
                 + 4 * C * TL * 4                  # f32 temporaries (x, xhat, y, ...)
                 + 2 * C * 128 * 4)                # padded aux
    out = pl.pallas_call(
        _norm_proj_residual_kernel,
        out_shape=jax.ShapeDtypeStruct((N, C, L), act_dtype),
        grid_spec=pltpu.PrefetchScalarGridSpec(
            num_scalar_prefetch=0,
            grid=(N, n_lt),
            in_specs=[
                pl.BlockSpec((1, C, TL), lambda n, l: (n, 0, l)),    # x tile
                pl.BlockSpec((1, C, 3), lambda n, l: (n, 0, 0)),     # [mean, rstd, bias]
                pl.BlockSpec((C, C), lambda n, l: (0, 0)),           # folded weight
            ],
            out_specs=pl.BlockSpec((1, C, TL), lambda n, l: (n, 0, l)),
        ),
        compiler_params=pltpu.CompilerParams(
            dimension_semantics=("parallel", "parallel"),            # megacore-shardable on v7x
            vmem_limit_bytes=_vmem_limit(int(1.5 * vmem_need)),
        ),
        cost_estimate=pl.CostEstimate(
            flops=int(N * (2 * C * C * L + 6 * C * L)),
            transcendentals=0,
            bytes_accessed=int(2 * N * C * L * itemsize + w_bytes + N * C * 3 * 4),
        ),
    )(x_cl, aux, w_g)

    return out.reshape(N, C, H, W)


# --------------------------------------------------------------------------------------------
# pure-JAX reference (mirrors the PyTorch forward, INCLUDING the softmax/einsum quirk)
# --------------------------------------------------------------------------------------------
def reference(x, params):
    N, C, H, W = x.shape
    G = NUM_GROUPS
    x = x.astype(jnp.float32)
    xg = x.reshape(N, G, C // G, H, W)
    mean = xg.mean(axis=(2, 3, 4), keepdims=True)
    var = xg.var(axis=(2, 3, 4), keepdims=True)
    xn = ((xg - mean) / jnp.sqrt(var + EPS)).reshape(N, C, H, W)
    xn = xn * params["gamma"][None, :, None, None] + params["beta"][None, :, None, None]
    t = jnp.transpose(xn.reshape(N, C, H * W), (0, 2, 1))            # (N, L, C)
    xp = t @ params["w_in"].T + params["b_in"]
    q, k, v = jnp.split(xp, 3, axis=-1)
    att = jnp.einsum("bld,bmd->blm", q, k) / math.sqrt(C)
    p = jax.nn.softmax(att, axis=-1)
    s = p.sum(axis=-1, keepdims=True)                                # == 1 up to fp noise
    opt = s * v                                                      # reference einsum collapses to this
    o = opt @ params["w_out"].T + params["b_out"]
    o = jnp.transpose(o, (0, 2, 1)).reshape(N, C, H, W)
    return o + x


def make_params(key, channels):
    C = channels
    k = jax.random.split(key, 6)
    return {
        "gamma": 1.0 + 0.1 * jax.random.normal(k[0], (C,), jnp.float32),
        "beta": 0.1 * jax.random.normal(k[1], (C,), jnp.float32),
        "w_in": jax.random.normal(k[2], (3 * C, C), jnp.float32) / math.sqrt(C),
        "b_in": 0.05 * jax.random.normal(k[3], (3 * C,), jnp.float32),
        "w_out": jax.random.normal(k[4], (C, C), jnp.float32) / math.sqrt(C),
        "b_out": 0.05 * jax.random.normal(k[5], (C,), jnp.float32),
    }


if __name__ == "__main__":
    key = jax.random.PRNGKey(0)
    kx, kp = jax.random.split(key)

    N, C, H, W = 2, 64, 16, 16        # channels must be divisible by 32 (GroupNorm(32, C))
    x = jax.random.normal(kx, (N, C, H, W), jnp.float32)
    params = make_params(kp, C)

    ref = reference(x, params)

    # f32-matmul path: tight check of the kernel math (folding noise only).
    out_f32 = vae_attention_block(x, params, matmul_dtype=jnp.float32)
    jax.block_until_ready(out_f32)
    assert out_f32.shape == (N, C, H, W)
    assert jnp.allclose(out_f32, ref, rtol=1e-3, atol=1e-3), "f32 kernel mismatch vs JAX reference"

    # bf16-MXU fast path (default): looser tolerance from bf16 matmul operands.
    out_bf16 = vae_attention_block(x, params, matmul_dtype=jnp.bfloat16)
    jax.block_until_ready(out_bf16)
    assert out_bf16.shape == (N, C, H, W)
    assert jnp.allclose(out_bf16, ref, rtol=3e-2, atol=3e-2), "bf16 kernel mismatch vs JAX reference"

    print("KERNEL_OK")
</pallas_src>

<mosaic_0001>
module attributes {stable_mosaic.version = 11 : i64} {
  func.func @_group_stats_kernel(%arg0: i32, %arg1: i32, %arg2: memref<1x64x256xf32, #tpu.memory_space<vmem>>, %arg3: memref<1x64x2xf32, #tpu.memory_space<vmem>>) attributes {dimension_semantics = [#tpu.dimension_semantics<parallel>, #tpu.dimension_semantics<arbitrary>], iteration_bounds = array<i64: 2, 1>, scalar_prefetch = 0 : i64, scratch_operands = 0 : i64, tpu.core_type = #tpu.core_type<tc>, window_params = [{transform_indices = @transform_0, window_bounds = array<i64: 1, 64, 256>}, {transform_indices = @transform_1, window_bounds = array<i64: 1, 64, 2>}]} {
    %c0_i32 = arith.constant 0 : i32
    %0 = arith.cmpi eq, %arg1, %c0_i32 : i32
    %1 = arith.extui %0 : i1 to i32
    %c0_i32_0 = arith.constant 0 : i32
    %2 = arith.cmpi ne, %1, %c0_i32_0 : i32
    scf.if %2 {
      %cst_15 = arith.constant 0.000000e+00 : f32
      %22 = vector.broadcast %cst_15 : f32 to vector<1x64x2xf32>
      %c0_16 = arith.constant 0 : index
      %c0_17 = arith.constant 0 : index
      %c0_18 = arith.constant 0 : index
      %23 = vector.load %arg3[%c0_16, %c0_17, %c0_18] : memref<1x64x2xf32, #tpu.memory_space<vmem>>, vector<1x64x2xf32>
      tpu.vector_store %arg3[%c0_16, %c0_17, %c0_18], %22 {strides = array<i32>} : memref<1x64x2xf32, #tpu.memory_space<vmem>>, vector<1x64x2xf32>,
    } else {
    }
    %c0 = arith.constant 0 : index
    %c0_1 = arith.constant 0 : index
    %c0_2 = arith.constant 0 : index
    %3 = vector.load %arg2[%c0, %c0_1, %c0_2] : memref<1x64x256xf32, #tpu.memory_space<vmem>>, vector<1x64x256xf32>
    %4 = vector.shape_cast %3 : vector<1x64x256xf32> to vector<64x256xf32>
    %c0_3 = arith.constant 0 : index
    %c0_4 = arith.constant 0 : index
    %c0_5 = arith.constant 0 : index
    %5 = vector.load %arg3[%c0_3, %c0_4, %c0_5] : memref<1x64x2xf32, #tpu.memory_space<vmem>>, vector<1x64x1xf32>
    %6 = vector.shape_cast %5 : vector<1x64x1xf32> to vector<64x1xf32>
    %cst = arith.constant dense<0.000000e+00> : vector<64xf32>
    %7 = vector.multi_reduction <add>, %4, %cst [1] : vector<64x256xf32> to vector<64xf32>
    %8 = vector.shape_cast %7 : vector<64xf32> to vector<64x1xf32>
    %9 = arith.addf %6, %8 : vector<64x1xf32>
    %c0_6 = arith.constant 0 : index
    %c0_7 = arith.constant 0 : index
    %c0_8 = arith.constant 0 : index
    %10 = vector.load %arg3[%c0_6, %c0_7, %c0_8] : memref<1x64x2xf32, #tpu.memory_space<vmem>>, vector<1x64x1xf32>
    %11 = vector.shape_cast %10 : vector<1x64x1xf32> to vector<64x1xf32>
    %12 = vector.shape_cast %9 : vector<64x1xf32> to vector<1x64x1xf32>
    tpu.vector_store %arg3[%c0_6, %c0_7, %c0_8], %12 {strides = array<i32>} : memref<1x64x2xf32, #tpu.memory_space<vmem>>, vector<1x64x1xf32>,
    %c0_9 = arith.constant 0 : index
    %c0_10 = arith.constant 0 : index
    %c1 = arith.constant 1 : index
    %13 = vector.load %arg3[%c0_9, %c0_10, %c1] : memref<1x64x2xf32, #tpu.memory_space<vmem>>, vector<1x64x1xf32>
    %14 = vector.shape_cast %13 : vector<1x64x1xf32> to vector<64x1xf32>
    %15 = arith.mulf %4, %4 : vector<64x256xf32>
    %cst_11 = arith.constant dense<0.000000e+00> : vector<64xf32>
    %16 = vector.multi_reduction <add>, %15, %cst_11 [1] : vector<64x256xf32> to vector<64xf32>
    %17 = vector.shape_cast %16 : vector<64xf32> to vector<64x1xf32>
    %18 = arith.addf %14, %17 : vector<64x1xf32>
    %c0_12 = arith.constant 0 : index
    %c0_13 = arith.constant 0 : index
    %c1_14 = arith.constant 1 : index
    %19 = vector.load %arg3[%c0_12, %c0_13, %c1_14] : memref<1x64x2xf32, #tpu.memory_space<vmem>>, vector<1x64x1xf32>
    %20 = vector.shape_cast %19 : vector<1x64x1xf32> to vector<64x1xf32>
    %21 = vector.shape_cast %18 : vector<64x1xf32> to vector<1x64x1xf32>
    tpu.vector_store %arg3[%c0_12, %c0_13, %c1_14], %21 {strides = array<i32>} : memref<1x64x2xf32, #tpu.memory_space<vmem>>, vector<1x64x1xf32>,
    return
  }
  func.func @transform_0(%arg0: i32, %arg1: i32) -> (i32, i32, i32) {
    %c0_i32 = arith.constant 0 : i32
    %c0_i32_0 = arith.constant 0 : i32
    return %arg0, %c0_i32, %arg1 : i32, i32, i32
  }
  func.func @transform_1(%arg0: i32, %arg1: i32) -> (i32, i32, i32) {
    %c0_i32 = arith.constant 0 : i32
    %c0_i32_0 = arith.constant 0 : i32
    %c0_i32_1 = arith.constant 0 : i32
    return %arg0, %c0_i32, %c0_i32_0 : i32, i32, i32
  }
}

</mosaic_0001>

<bundles_post_ra>
// kernel: tpu_custom_call.1
= control target key start
LH: loop header
LB: loop body
LE: loop exit
PB: predicated region body
PF: predicated region fallthrough
CT: control target
= control target key end

     0   :  { %6 = vsyncpa [#allocation3], 0  ;;  %s744_s0 = inlined_call_operand.hbm [shape: f32[2,64,256], index: 0, kind: input, shape index: {}]   ;;  %s745_s1 = inlined_call_operand.vmem [shape: f32[2,64,2], index: 1, kind: output, shape index: {}]  }
   0x1   :  { %8 = vsyncpa [#allocation3 + $0x1], 0  ;;  %s544_s6 = smov 0   ;;  %s546_s7 = smov 0  }
   0x2   :  { %s548_s8 = smov 0   ;;  %s550_s9 = smov 0  }
   0x3   :  { %s552_s10 = smov 0   ;;  %s554_s11 = smov 0  }
   0x4 LB: > { %s375_s12 = sadd.s32 4294967295, %s528_s11   ;;  %s26_s13 = sadd.s32 1, %s524_s10  ;;  %s528_s11 = sphi %s554_s11, %s14_s11   ;;  %s524_s10 = sphi %s552_s10, %s753_s10   ;;  %s520_s9 = sphi %s550_s9, %s752_s9   ;;  %s516_s8 = sphi %s548_s8, %s751_s8   ;;  %s512_s7 = sphi %s546_s7, %s750_s7   ;;  %s508_s6 = sphi %s544_s6, %s749_s6  }
   0x5   : > { %p28_p0 = scmp.ge.s32.totalorder %s26_s13, 2  ;;  %s35_s14 = sadd.s32 1, %s516_s8 }
   0x6   : > { %p42_p1 = scmp.ne.s32.totalorder %s516_s8, %s512_s7  ;;  %p43_p2 = scmp.eq.s32.totalorder %s528_s11, 0 }
   0x7   : > { %s755_s13 = smov (%p28_p0, %s26_s13), 0  ;;  %p48_p4 = scmp.ne.s32.totalorder %s512_s7, %s508_s6 }
   0x8   : > { %p580_p3 = por %p43_p2, %p42_p1  ;;  %s30_s16 = ssub.s32 %s524_s10, %s755_s13 }
   0x9   : > { %p49_p5 = scmp.eq.s32.totalorder %s375_s12, 0  ;;  %p33_p6 = scmp.eq.s32.totalorder %s30_s16, 0 }
   0xa   : > { %p396_p8 = scmp.lt.s32.totalorder %s528_s11, 2  ;;  %s98_s19 = sand.u32 1, %s516_s8  }
   0xb   : > { %p587_p7 = por %p49_p5, %p48_p4  ;;  %s388_s20 = sshll.u32 %s524_s10, 11 }
   0xc   : > { %s593_s18 = scalar_select %p33_p6, %s516_s8, %s35_s14  }
   0xd   : > { %s379_s21 = sshll.u32 %s98_s19, 7  ;;  %s600_s24 = scalar_lea.hbm %s744_s0, %s388_s20 }
   0xe   : > { %s102_s25 = scalar_lea.vmem [#allocation2], %s379_s21  ;;  %p604_p9 = pnand %p396_p8, %p580_p3 }
   0xf   : > { %s111_s26 = sshll.u32 %s102_s25, 4  ;;  %s610_s28 = scalar_lea.sflag [#allocation3], %s98_s19  ;;  %s608_s26 = int_to_ptr.vmem [resolvable:$true] %s111_s26 }
  0x10   : > { %s448_s29 = scalar_lea.hbm %s600_s24, 2048  ;;  %p450_p11 = pneg %p604_p9 }
  0x11   : > { %p449_p10 = scmp.ne.s32.totalorder %s600_s24, %s448_s29  ;;  %s453_s3 = scalar_lea.hbm %s744_s0, 4096 }
  0x12   : > { %p454_p0 = scmp.lt.u32.totalorder %s600_s24, %s744_s0  ;;  %p455_p1 = scmp.lt.u32.totalorder %s453_s3, %s448_s29 }
  0x13   : > { %p451_p12 = pnand %p450_p11, %p449_p10  ;;  %p457_p3 = scmp.lt.u32.totalorder %s448_s29, %s600_s24 }
  0x14   : > { %p456_p2 = por %p455_p1, %p454_p0 }
  0x15   : > { %p452_p13 = pneg %p451_p12 }
  0x16   : > { %p458_p4 = por %p457_p3, %p456_p2 }
  0x18   : > { %p459_p5 = pnand %p458_p4, %p452_p13 }
  0x1a   : > { %462 = shalt.err (!%p459_p5)
}
  0x1b   : > { %s463_s6 = scalar_lea.vmem %s608_s26, 2048  ;;  %s530_s12 = smov [#allocation2]  }
  0x1c   : > { %p464_p6 = scmp.ne.s32.totalorder %s608_s26, %s463_s6  ;;  %s468_s14 = sshll.u32 %s530_s12, 4  ;;  %s469_s14 = int_to_ptr.vmem [resolvable:$false] %s468_s14 }
  0x1d   : > { %s470_s15 = scalar_lea.vmem %s469_s14, 4096  ;;  %p471_p12 = scmp.lt.s32.totalorder %s608_s26, %s469_s14 }
  0x1e   : > { %p466_p8 = pnand %p464_p6, %p450_p11  ;;  %p472_p0 = scmp.lt.s32.totalorder %s470_s15, %s463_s6 }
  0x20   : > { %p467_p10 = pneg %p466_p8  ;;  %p473_p1 = por %p472_p0, %p471_p12 }
  0x22   : > { %p474_p2 = pnand %p473_p1, %p467_p10 }
  0x24   : > { %477 = shalt.err (!%p474_p2)
}
  0x25   : > { %s531_s16 = smov 256   ;;  %s532_s19 = smov 16  }
  0x26   : > { %395 = dma.hbm_to_vmem [thread:$0]  (!%p604_p9), %s600_s24, 2048, %s608_s26, %s610_s28, %s531_s16, %s531_s16, %s532_s19  }
  0x27   : > { %p382_p11 = scmp.ge.s32.totalorder %s528_s11, 1  ;;  %p119_p13 = scmp.lt.s32.totalorder %s528_s11, 3 }
  0x29   : > { %p120_p3 = pnand %p382_p11, %p119_p13 }
  0x2a   : > { %s125_s20 = sand.u32 (!%p120_p3), 1, %s512_s7  }
  0x2b   : > { %123 = sbr.rel (%p120_p3) target bundleno = 228 (0xe4), region = 24  ;;  %s383_s21 = sshll.u32 (!%p120_p3), %s125_s20, 7 }
  0x2c   : > { %s126_s22 = scalar_lea.sflag (!%p120_p3), [#allocation3], %s125_s20  ;;  %s641_s23 = scalar_lea.vmem (!%p120_p3), [#allocation2], %s383_s21 }
  0x32   : > { %503 = dma.done.wait (%p587_p7), %s126_s22, 2048  }
  0x33   : > { %505 = vsyncadd (%p587_p7), %s126_s22, 4294965248  ;;  %p149_p9 = scmp.lt.s32.totalorder %s520_s9, 1  ;;  %vm158_vm0 = vcmask 15360   ;;  %v533_v0 = vmov 0.0   ;;  %v171_v1 = vld [vmem:[%s641_s23 + $0x20] sm:$0xff]  ;;  %v172_v2 = vld [vmem:[%s641_s23 + $0x28] sm:$0xff] }
  0x34   : > { %v167_v3 = vld [vmem:[%s641_s23] sm:$0xff]  ;;  %v197_v4 = vadd.f32 %v172_v2, %v171_v1  ;;  %v168_v5 = vld [vmem:[%s641_s23 + $0x8] sm:$0xff]  ;;  %v173_v6 = vld [vmem:[%s641_s23 + $0x30] sm:$0xff]  ;;  %v244_v32 = vmul.f32 %v171_v1, %v171_v1  ;;  %v245_v33 = vmul.f32 %v172_v2, %v172_v2  ;;  %vm223_vm1 = vcmask 7168  }
  0x35   : > { %s757_s9 = smov (!%p149_p9, %s520_s9), 1  ;;  %v174_v7 = vld [vmem:[%s641_s23 + $0x38] sm:$0xff]  ;;  %v191_v8 = vadd.f32 %v168_v5, %v167_v3  ;;  %v169_v9 = vld [vmem:[%s641_s23 + $0x10] sm:$0xff]  ;;  %v175_v15 = vld [vmem:[%s641_s23 + $0x40] sm:$0xff]  ;;  %v240_v26 = vmul.f32 %v167_v3, %v167_v3  ;;  %v241_v27 = vmul.f32 %v168_v5, %v168_v5  ;;  %v246_v30 = vmul.f32 %v173_v6, %v173_v6 }
  0x36   : > { %s389_s24 = sshll.u32 %s757_s9, 6  ;;  %v170_v10 = vld [vmem:[%s641_s23 + $0x18] sm:$0xff]  ;;  %198 = vadd.xlane.f32.xlu1 %v197_v4  ;;  %v200_v11 = vadd.f32 %v174_v7, %v173_v6  ;;  %v177_v13 = vld [vmem:[%s641_s23 + $0x50] sm:$0xff]  ;;  %v176_v16 = vld [vmem:[%s641_s23 + $0x48] sm:$0xff]  ;;  %v242_v24 = vmul.f32 %v169_v9, %v169_v9  ;;  %v247_v31 = vmul.f32 %v174_v7, %v174_v7  ;;  %v262_v38 = vadd.f32 %v245_v33, %v244_v32 }
  0x37   : > { %s652_s27 = scalar_lea.vmem %s745_s1, %s389_s24  ;;  %192 = vadd.xlane.f32.xlu0 %v191_v8  ;;  %v194_v12 = vadd.f32 %v170_v10, %v169_v9  ;;  %v178_v14 = vld [vmem:[%s641_s23 + $0x58] sm:$0xff]  ;;  %v203_v18 = vadd.f32 %v176_v16, %v175_v15  ;;  %v181_v19 = vld [vmem:[%s641_s23 + $0x70] sm:$0xff]  ;;  %v179_v21 = vld [vmem:[%s641_s23 + $0x60] sm:$0xff]  ;;  %v243_v25 = vmul.f32 %v170_v10, %v170_v10  ;;  %v256_v34 = vadd.f32 %v241_v27, %v240_v26 }
  0x38   : > { %161 = vst.msk [vmem:[%s652_s27 + $0x10] sm:$0xff] %vm158_vm0, %v533_v0  ;;  %159 = vst.msk [vmem:[%s652_s27] sm:$0xff] %vm158_vm0, %v533_v0  ;;  %v206_v17 = vadd.f32 %v178_v14, %v177_v13  ;;  %v182_v20 = vld [vmem:[%s641_s23 + $0x78] sm:$0xff]  ;;  %v180_v22 = vld [vmem:[%s641_s23 + $0x68] sm:$0xff]  ;;  %v265_v35 = vadd.f32 %v247_v31, %v246_v30  ;;  %v250_v36 = vmul.f32 %v177_v13, %v177_v13  ;;  %vm288_vm2 = vcmask 15368  }
  0x39   : > { %160 = vst.msk [vmem:[%s652_s27 + $0x8] sm:$0xff] %vm158_vm0, %v533_v0  ;;  %162 = vst.msk [vmem:[%s652_s27 + $0x18] sm:$0xff] %vm158_vm0, %v533_v0  ;;  %v212_v23 = vadd.f32 %v182_v20, %v181_v19  ;;  %v209_v28 = vadd.f32 %v180_v22, %v179_v21  ;;  %v259_v29 = vadd.f32 %v243_v25, %v242_v24 }
  0x3a   : > { %163 = vst.msk [vmem:[%s652_s27 + $0x20] sm:$0xff] %vm158_vm0, %v533_v0  ;;  %164 = vst.msk [vmem:[%s652_s27 + $0x28] sm:$0xff] %vm158_vm0, %v533_v0  ;;  %201 = vadd.xlane.f32.xlu1 %v200_v11  ;;  %v251_v37 = vmul.f32 %v178_v14, %v178_v14  ;;  %v248_v39 = vmul.f32 %v175_v15, %v175_v15  ;;  %v249_v40 = vmul.f32 %v176_v16, %v176_v16 }
  0x3b   : > { %165 = vst.msk [vmem:[%s652_s27 + $0x30] sm:$0xff] %vm158_vm0, %v533_v0  ;;  %166 = vst.msk [vmem:[%s652_s27 + $0x38] sm:$0xff] %vm158_vm0, %v533_v0  ;;  %195 = vadd.xlane.f32.xlu0 %v194_v12  ;;  %v254_v42 = vmul.f32 %v181_v19, %v181_v19  ;;  %v255_v43 = vmul.f32 %v182_v20, %v182_v20  ;;  %v252_v45 = vmul.f32 %v179_v21, %v179_v21 }
  0x3c   : > { %v271_v41 = vadd.f32 %v251_v37, %v250_v36  ;;  %v268_v44 = vadd.f32 %v249_v40, %v248_v39  ;;  %v253_v46 = vmul.f32 %v180_v22, %v180_v22 }
  0x3d   : > { %v277_v47 = vadd.f32 %v255_v43, %v254_v42 }
  0x3e   : > { %207 = vadd.xlane.f32.xlu1 %v206_v17  ;;  %v274_v48 = vadd.f32 %v253_v46, %v252_v45 }
  0x3f   : > { %204 = vadd.xlane.f32.xlu0 %v203_v18  ;;  %v185_v49 = vld [vmem:[%s652_s27 + $0x10] sm:$0xff]  ;;  %v183_v50 = vld [vmem:[%s652_s27] sm:$0xff] }
  0x40   : > { %v186_v55 = vld [vmem:[%s652_s27 + $0x18] sm:$0xff]  ;;  %v184_v56 = vld [vmem:[%s652_s27 + $0x8] sm:$0xff] }
  0x41   : > { %v188_v61 = vld [vmem:[%s652_s27 + $0x28] sm:$0xff]  ;;  %v187_v62 = vld [vmem:[%s652_s27 + $0x20] sm:$0xff] }
  0x42   : > { %213 = vadd.xlane.f32.xlu1 %v212_v23  ;;  %v190_v3 = vld [vmem:[%s652_s27 + $0x38] sm:$0xff]  ;;  %v189_v4 = vld [vmem:[%s652_s27 + $0x30] sm:$0xff] }
  0x43   : > { %210 = vadd.xlane.f32.xlu0 %v209_v28 }
  0x46   : > { %260 = vadd.xlane.f32.xlu1 %v259_v29 }
  0x47   : > { %257 = vadd.xlane.f32.xlu0 %v256_v34 }
  0x4a   : > { %266 = vadd.xlane.f32.xlu1 %v265_v35 }
  0x4b   : > { %263 = vadd.xlane.f32.xlu0 %v262_v38 }
  0x4e   : > { %272 = vadd.xlane.f32.xlu1 %v271_v41 }
  0x4f   : > { %269 = vadd.xlane.f32.xlu0 %v268_v44 }
  0x52   : > { %278 = vadd.xlane.f32.xlu1 %v277_v47 }
  0x53   : > { %275 = vadd.xlane.f32.xlu0 %v274_v48 }
  0xc3   : > { %v199_v51 = vpop.xlane.xlu1 %198 }
  0xc4   : > { %v217_v52 = vadd.f32 %v199_v51, %v185_v49  ;;  %v193_v53 = vpop.xlane.xlu0 %192 }
  0xc5   : > { %v215_v54 = vadd.f32 %v193_v53, %v183_v50 }
  0xc6   : > { %226 = vst.msk [vmem:[%s652_s27 + $0x10] sm:$0xff] %vm223_vm1, %v217_v52 }
  0xc7   : > { %224 = vst.msk [vmem:[%s652_s27] sm:$0xff] %vm223_vm1, %v215_v54  ;;  %v202_v57 = vpop.xlane.xlu1 %201 }
  0xc8   : > { %v218_v58 = vadd.f32 %v202_v57, %v186_v55  ;;  %v196_v59 = vpop.xlane.xlu0 %195 }
  0xc9   : > { %v216_v60 = vadd.f32 %v196_v59, %v184_v56 }
  0xca   : > { %227 = vst.msk [vmem:[%s652_s27 + $0x18] sm:$0xff] %vm223_vm1, %v218_v58 }
  0xcb   : > { %225 = vst.msk [vmem:[%s652_s27 + $0x8] sm:$0xff] %vm223_vm1, %v216_v60  ;;  %v208_v63 = vpop.xlane.xlu1 %207 }
  0xcc   : > { %v220_v0 = vadd.f32 %v208_v63, %v188_v61  ;;  %v205_v1 = vpop.xlane.xlu0 %204 }
  0xcd   : > { %v219_v2 = vadd.f32 %v205_v1, %v187_v62  ;;  %v234_v19 = vld [vmem:[%s652_s27 + $0x10] sm:$0xff] }
  0xce   : > { %229 = vst.msk [vmem:[%s652_s27 + $0x28] sm:$0xff] %vm223_vm1, %v220_v0  ;;  %v232_v13 = vld [vmem:[%s652_s27] sm:$0xff] }
  0xcf   : > { %228 = vst.msk [vmem:[%s652_s27 + $0x20] sm:$0xff] %vm223_vm1, %v219_v2  ;;  %v214_v5 = vpop.xlane.xlu1 %213 }
  0xd0   : > { %v222_v6 = vadd.f32 %v214_v5, %v190_v3  ;;  %v211_v7 = vpop.xlane.xlu0 %210 }
  0xd1   : > { %v221_v8 = vadd.f32 %v211_v7, %v189_v4  ;;  %v235_v16 = vld [vmem:[%s652_s27 + $0x18] sm:$0xff] }
  0xd2   : > { %231 = vst.msk [vmem:[%s652_s27 + $0x38] sm:$0xff] %vm223_vm1, %v222_v6  ;;  %v233_v10 = vld [vmem:[%s652_s27 + $0x8] sm:$0xff] }
  0xd3   : > { %230 = vst.msk [vmem:[%s652_s27 + $0x30] sm:$0xff] %vm223_vm1, %v221_v8  ;;  %v261_v9 = vpop.xlane.xlu1 %260 }
  0xd4   : > { %v281_v11 = vadd.f32 %v261_v9, %v233_v10  ;;  %v258_v12 = vpop.xlane.xlu0 %257 }
  0xd5   : > { %v280_v14 = vadd.f32 %v258_v12, %v232_v13  ;;  %v237_v22 = vld [vmem:[%s652_s27 + $0x28] sm:$0xff] }
  0xd6   : > { %290 = vst.msk [vmem:[%s652_s27 + $0x8] sm:$0xff] %vm288_vm2, %v281_v11  ;;  %v236_v25 = vld [vmem:[%s652_s27 + $0x20] sm:$0xff] }
  0xd7   : > { %289 = vst.msk [vmem:[%s652_s27] sm:$0xff] %vm288_vm2, %v280_v14  ;;  %v267_v15 = vpop.xlane.xlu1 %266 }
  0xd8   : > { %v283_v17 = vadd.f32 %v267_v15, %v235_v16  ;;  %v264_v18 = vpop.xlane.xlu0 %263 }
  0xd9   : > { %v282_v20 = vadd.f32 %v264_v18, %v234_v19  ;;  %v239_v28 = vld [vmem:[%s652_s27 + $0x38] sm:$0xff] }
  0xda   : > { %292 = vst.msk [vmem:[%s652_s27 + $0x18] sm:$0xff] %vm288_vm2, %v283_v17  ;;  %v238_v31 = vld [vmem:[%s652_s27 + $0x30] sm:$0xff] }
  0xdb   : > { %291 = vst.msk [vmem:[%s652_s27 + $0x10] sm:$0xff] %vm288_vm2, %v282_v20  ;;  %v273_v21 = vpop.xlane.xlu1 %272 }
  0xdc   : > { %v285_v23 = vadd.f32 %v273_v21, %v237_v22  ;;  %v270_v24 = vpop.xlane.xlu0 %269 }
  0xdd   : > { %v284_v26 = vadd.f32 %v270_v24, %v236_v25 }
  0xde   : > { %294 = vst.msk [vmem:[%s652_s27 + $0x28] sm:$0xff] %vm288_vm2, %v285_v23 }
  0xdf   : > { %293 = vst.msk [vmem:[%s652_s27 + $0x20] sm:$0xff] %vm288_vm2, %v284_v26  ;;  %v279_v27 = vpop.xlane.xlu1 %278 }
  0xe0   : > { %v287_v29 = vadd.f32 %v279_v27, %v239_v28  ;;  %v276_v30 = vpop.xlane.xlu0 %275 }
  0xe1   : > { %v286_v32 = vadd.f32 %v276_v30, %v238_v31 }
  0xe2   : > { %296 = vst.msk [vmem:[%s652_s27 + $0x38] sm:$0xff] %vm288_vm2, %v287_v29 }
  0xe3   : > { %295 = vst.msk [vmem:[%s652_s27 + $0x30] sm:$0xff] %vm288_vm2, %v286_v32 }
  0xe4 PF: > { %s14_s11 = sadd.s32 1, %s528_s11   ;;  %s749_s6 = smov %s512_s7 }
  0xe5   : > { %p11_p7 = scmp.ge.s32.totalorder %s14_s11, 4   ;;  %s750_s7 = smov %s516_s8 }
  0xe6   : > { %s751_s8 = smov %s593_s18  ;;  %s752_s9 = smov %s524_s10 }
  0xe7   : > { %s753_s10 = smov %s755_s13  ;;  %13 = sbr.rel (!%p11_p7) target bundleno = 4 (0x4), region = 68 }
  0xee   :  { %318 = vsyncpa [#allocation3], 1 }
  0xef   :  { %320 = vsyncpa [#allocation3 + $0x1], 1 }

</bundles_post_ra>
